<compile_context>
chip_gen: v5e
topology: v5e:2x2
jax: 0.10.0
libtpu: 0.0.40
codegen_flags: <defaults>
</compile_context>

<pallas_src>
import jax
import jax.numpy as jnp
from jax.experimental import pallas as pl
from jax.experimental.pallas import tpu as pltpu

# TODO(synk): the pretrained `bert-base-uncased` encoder (AutoModel) has no clean
# in-script Pallas equivalent; the kernel consumes pre-computed hidden states.

_NPAD = 128      # classifier output padded to one full lane group
_NUM_CLASSES = 2


def _disc_head_kernel(cls_ref, w_ref, b_ref, lbl_ref, logits_ref, loss_ref):
    # cls_ref:    (TB, H)     [CLS] hidden states for this batch tile
    # w_ref:      (H, 128)    classifier weight, real classes in lanes [0, 2)
    # b_ref:      (1, 128)    classifier bias, real classes in lanes [0, 2)
    # lbl_ref:    (TB, 1)     int32 labels
    # logits_ref: (TB, 128)   padded logits out
    # loss_ref:   (TB, 1)     per-example cross-entropy out
    h0 = cls_ref[...]                                                   # (TB, H)
    logits = jnp.dot(h0, w_ref[...],
                     preferred_element_type=jnp.float32) + b_ref[...]   # (TB, 128)
    logits_ref[...] = logits

    # softmax cross-entropy over the 2 real classes (padded lanes masked out)
    lane = jax.lax.broadcasted_iota(jnp.int32, logits.shape, 1)         # (TB, 128)
    masked = jnp.where(lane < _NUM_CLASSES, logits, jnp.float32(-1e30))
    m = jnp.max(masked, axis=-1, keepdims=True)                         # (TB, 1)
    lse = m + jnp.log(jnp.sum(jnp.exp(masked - m), axis=-1, keepdims=True))
    picked = jnp.sum(jnp.where(lane == lbl_ref[...], logits, 0.0),
                     axis=-1, keepdims=True)                            # (TB, 1)
    loss_ref[...] = lse - picked


def discriminator_forward(hidden_states, labels, weight, bias):
    """hidden_states: (B, S, H) f32, labels: (B,) int32,
       weight: (H, 2) f32, bias: (2,) f32  ->  (logits (B, 2), loss (B,))"""
    B, S, H = hidden_states.shape

    # [CLS] pooling at the DMA boundary: only B*H elements enter the kernel.
    cls = hidden_states[:, 0, :]                                        # (B, H)

    # lane-dense classifier parameters (real classes live in lanes 0..1)
    w_pad = jnp.zeros((H, _NPAD), jnp.float32).at[:, :_NUM_CLASSES].set(
        weight.astype(jnp.float32))
    b_pad = jnp.zeros((1, _NPAD), jnp.float32).at[:, :_NUM_CLASSES].set(
        bias.astype(jnp.float32))
    lbl2d = labels.astype(jnp.int32).reshape(B, 1)

    TB = B if B <= 512 else 512            # batch tile (full batch when small)
    grid = (pl.cdiv(B, TB),)

    logits_pad, loss = pl.pallas_call(
        _disc_head_kernel,
        out_shape=(
            jax.ShapeDtypeStruct((B, _NPAD), jnp.float32),
            jax.ShapeDtypeStruct((B, 1), jnp.float32),
        ),
        grid=grid,
        in_specs=[
            pl.BlockSpec((TB, H), lambda i: (i, 0)),        # CLS rows
            pl.BlockSpec((H, _NPAD), lambda i: (0, 0)),     # weight (resident)
            pl.BlockSpec((1, _NPAD), lambda i: (0, 0)),     # bias   (resident)
            pl.BlockSpec((TB, 1), lambda i: (i, 0)),        # labels
        ],
        out_specs=(
            pl.BlockSpec((TB, _NPAD), lambda i: (i, 0)),
            pl.BlockSpec((TB, 1), lambda i: (i, 0)),
        ),
        compiler_params=pltpu.CompilerParams(
            dimension_semantics=("parallel",)),
        cost_estimate=pl.CostEstimate(
            flops=2 * B * H * _NPAD,
            transcendentals=B * _NUM_CLASSES,
            bytes_accessed=(B * H + H * _NPAD + _NPAD + B
                            + B * _NPAD + B) * 4),
    )(cls, w_pad, b_pad, lbl2d)

    return logits_pad[:, :_NUM_CLASSES], loss[:, 0]


if __name__ == "__main__":
    B, S, H = 2, 8, 32  # small stand-in for (batch, seq_len, bert hidden_size=768)

    key = jax.random.PRNGKey(0)
    k_x, k_w, k_b = jax.random.split(key, 3)

    hidden_states = jax.random.normal(k_x, (B, S, H), dtype=jnp.float32)
    labels = jnp.array([0, 1], dtype=jnp.int32)

    # deterministic init of the Linear(hidden_size, 2) head
    weight = jax.random.normal(k_w, (H, 2), dtype=jnp.float32) / jnp.sqrt(H)
    bias = jax.random.normal(k_b, (2,), dtype=jnp.float32) * 0.01

    logits, loss = discriminator_forward(hidden_states, labels, weight, bias)
    jax.block_until_ready((logits, loss))

    # pure-JAX reference check
    h0 = hidden_states[:, 0, :]
    ref_logits = h0 @ weight + bias
    ref_loss = -jax.nn.log_softmax(ref_logits)[jnp.arange(B), labels]
    assert jnp.allclose(logits, ref_logits, atol=1e-5)
    assert jnp.allclose(loss, ref_loss, atol=1e-5)

    print("KERNEL_OK")
</pallas_src>

<mosaic_0001>
module attributes {stable_mosaic.version = 11 : i64} {
  func.func @_disc_head_kernel(%arg0: i32, %arg1: memref<2x32xf32, #tpu.memory_space<vmem>>, %arg2: memref<32x128xf32, #tpu.memory_space<vmem>>, %arg3: memref<1x128xf32, #tpu.memory_space<vmem>>, %arg4: memref<2x1xi32, #tpu.memory_space<vmem>>, %arg5: memref<2x128xf32, #tpu.memory_space<vmem>>, %arg6: memref<2x1xf32, #tpu.memory_space<vmem>>) attributes {dimension_semantics = [#tpu.dimension_semantics<parallel>], iteration_bounds = array<i64: 1>, scalar_prefetch = 0 : i64, scratch_operands = 0 : i64, tpu.core_type = #tpu.core_type<tc>, window_params = [{transform_indices = @transform_0, window_bounds = array<i64: 2, 32>}, {pipeline_mode = #tpu.pipeline_mode<synchronous>, transform_indices = @transform_1, window_bounds = array<i64: 32, 128>}, {pipeline_mode = #tpu.pipeline_mode<synchronous>, transform_indices = @transform_2, window_bounds = array<i64: 1, 128>}, {transform_indices = @transform_3, window_bounds = array<i64: 2, 1>}, {transform_indices = @transform_4, window_bounds = array<i64: 2, 128>}, {transform_indices = @transform_5, window_bounds = array<i64: 2, 1>}]} {
    %c0 = arith.constant 0 : index
    %c0_0 = arith.constant 0 : index
    %0 = vector.load %arg1[%c0, %c0_0] : memref<2x32xf32, #tpu.memory_space<vmem>>, vector<2x32xf32>
    %c0_1 = arith.constant 0 : index
    %c0_2 = arith.constant 0 : index
    %1 = vector.load %arg2[%c0_1, %c0_2] : memref<32x128xf32, #tpu.memory_space<vmem>>, vector<32x128xf32>
    %cst = arith.constant dense<0.000000e+00> : vector<2x128xf32>
    %2 = tpu.matmul %0, %1, %cst {dimension_numbers = #tpu.dot_dimension_numbers<[1], [0], [0], [1], [0, 0, 1, 1], [], []>} : vector<2x32xf32>, vector<32x128xf32>, vector<2x128xf32> -> vector<2x128xf32>
    %c0_3 = arith.constant 0 : index
    %c0_4 = arith.constant 0 : index
    %3 = vector.load %arg3[%c0_3, %c0_4] : memref<1x128xf32, #tpu.memory_space<vmem>>, vector<1x128xf32>
    %4 = vector.broadcast %3 : vector<1x128xf32> to vector<2x128xf32>
    %5 = arith.addf %2, %4 : vector<2x128xf32>
    %c0_5 = arith.constant 0 : index
    %c0_6 = arith.constant 0 : index
    %6 = vector.load %arg5[%c0_5, %c0_6] : memref<2x128xf32, #tpu.memory_space<vmem>>, vector<2x128xf32>
    tpu.vector_store %arg5[%c0_5, %c0_6], %5 {strides = array<i32>} : memref<2x128xf32, #tpu.memory_space<vmem>>, vector<2x128xf32>,
    %7 = tpu.iota {dimensions = array<i32: 1>} : vector<2x128xi32>
    %c2_i32 = arith.constant 2 : i32
    %8 = vector.broadcast %c2_i32 : i32 to vector<2x128xi32>
    %9 = arith.cmpi slt, %7, %8 : vector<2x128xi32>
    %cst_7 = arith.constant -1.000000e+30 : f32
    %10 = vector.broadcast %cst_7 : f32 to vector<2x128xf32>
    %11 = arith.select %9, %5, %10 : vector<2x128xi1>, vector<2x128xf32>
    %cst_8 = arith.constant dense<0xFF800000> : vector<2xf32>
    %12 = vector.multi_reduction <maximumf>, %11, %cst_8 [1] : vector<2x128xf32> to vector<2xf32>
    %13 = vector.shape_cast %12 : vector<2xf32> to vector<2x1xf32>
    %14 = vector.broadcast %13 : vector<2x1xf32> to vector<2x128xf32>
    %15 = arith.subf %11, %14 : vector<2x128xf32>
    %16 = math.exp %15 : vector<2x128xf32>
    %cst_9 = arith.constant dense<0.000000e+00> : vector<2xf32>
    %17 = vector.multi_reduction <add>, %16, %cst_9 [1] : vector<2x128xf32> to vector<2xf32>
    %18 = vector.shape_cast %17 : vector<2xf32> to vector<2x1xf32>
    %19 = math.log %18 : vector<2x1xf32>
    %20 = arith.addf %13, %19 : vector<2x1xf32>
    %c0_10 = arith.constant 0 : index
    %c0_11 = arith.constant 0 : index
    %21 = vector.load %arg4[%c0_10, %c0_11] : memref<2x1xi32, #tpu.memory_space<vmem>>, vector<2x1xi32>
    %22 = vector.broadcast %21 : vector<2x1xi32> to vector<2x128xi32>
    %23 = arith.cmpi eq, %7, %22 : vector<2x128xi32>
    %cst_12 = arith.constant 0.000000e+00 : f32
    %24 = vector.broadcast %cst_12 : f32 to vector<2x128xf32>
    %25 = arith.select %23, %5, %24 : vector<2x128xi1>, vector<2x128xf32>
    %cst_13 = arith.constant dense<0.000000e+00> : vector<2xf32>
    %26 = vector.multi_reduction <add>, %25, %cst_13 [1] : vector<2x128xf32> to vector<2xf32>
    %27 = vector.shape_cast %26 : vector<2xf32> to vector<2x1xf32>
    %28 = arith.subf %20, %27 : vector<2x1xf32>
    %c0_14 = arith.constant 0 : index
    %c0_15 = arith.constant 0 : index
    %29 = vector.load %arg6[%c0_14, %c0_15] : memref<2x1xf32, #tpu.memory_space<vmem>>, vector<2x1xf32>
    tpu.vector_store %arg6[%c0_14, %c0_15], %28 {strides = array<i32>} : memref<2x1xf32, #tpu.memory_space<vmem>>, vector<2x1xf32>,
    return
  }
  func.func @transform_0(%arg0: i32) -> (i32, i32) {
    %c0_i32 = arith.constant 0 : i32
    %c0_i32_0 = arith.constant 0 : i32
    return %arg0, %c0_i32 : i32, i32
  }
  func.func @transform_1(%arg0: i32) -> (i32, i32) {
    %c0_i32 = arith.constant 0 : i32
    %c0_i32_0 = arith.constant 0 : i32
    %c0_i32_1 = arith.constant 0 : i32
    return %c0_i32, %c0_i32_0 : i32, i32
  }
  func.func @transform_2(%arg0: i32) -> (i32, i32) {
    %c0_i32 = arith.constant 0 : i32
    %c0_i32_0 = arith.constant 0 : i32
    %c0_i32_1 = arith.constant 0 : i32
    return %c0_i32, %c0_i32_0 : i32, i32
  }
  func.func @transform_3(%arg0: i32) -> (i32, i32) {
    %c0_i32 = arith.constant 0 : i32
    %c0_i32_0 = arith.constant 0 : i32
    return %arg0, %c0_i32 : i32, i32
  }
  func.func @transform_4(%arg0: i32) -> (i32, i32) {
    %c0_i32 = arith.constant 0 : i32
    %c0_i32_0 = arith.constant 0 : i32
    return %arg0, %c0_i32 : i32, i32
  }
  func.func @transform_5(%arg0: i32) -> (i32, i32) {
    %c0_i32 = arith.constant 0 : i32
    %c0_i32_0 = arith.constant 0 : i32
    return %arg0, %c0_i32 : i32, i32
  }
}

</mosaic_0001>

<bundles_post_ra>
// kernel: tpu_custom_call.1
= control target key start
LH: loop header
LB: loop body
LE: loop exit
PB: predicated region body
PF: predicated region fallthrough
CT: control target
= control target key end

     0   :  { %11 = vsyncpa [#allocation3], 0  ;;  %s240_s0 = inlined_call_operand.vmem [shape: f32[2,32], index: 0, kind: input, shape index: {}]   ;;  %s241_s1 = inlined_call_operand.hbm [shape: f32[32,128], index: 1, kind: input, shape index: {}]   ;;  %s242_s2 = inlined_call_operand.vmem [shape: f32[1,128], index: 2, kind: input, shape index: {}]   ;;  %s243_s3 = inlined_call_operand.vmem [shape: s32[2,1], index: 3, kind: input, shape index: {}]   ;;  %s244_s4 = inlined_call_operand.hbm [shape: f32[2,128], index: 4, kind: output, shape index: {0}]   ;;  %s245_s5 = inlined_call_operand.vmem [shape: f32[2,1], index: 5, kind: output, shape index: {1}]  }
   0x1   :  { %12 = vsyncpa [#allocation4], 0  ;;  %s19_s20 = sshll.u32 %s241_s1, 4  ;;  %s184_s21 = smov [#allocation2]   ;;  %s20_s20 = int_to_ptr.hbm [resolvable:$true] %s19_s20 }
   0x2   :  { %s21_s22 = sshll.u32 %s184_s21, 4  ;;  %s185_s23 = smov 128   ;;  %s22_s22 = int_to_ptr.vmem [resolvable:$true] %s21_s22 }
   0x3   :  { %s186_s24 = smov 8  }
   0x4   :  { %27 = dma.hbm_to_vmem [thread:$0]  %s20_s20, 512, %s22_s22, [#allocation3], %s185_s23, %s185_s23, %s186_s24  }
   0x5   :  { %180 = dma.done.wait [#allocation3], 512  }
   0x6   :  { %181 = vsyncadd [#allocation3], 4294966784  ;;  %v40_v0 = vld [vmem:[#allocation2 + $0x18] sm:$0xff]  ;;  %v39_v1 = vld [vmem:[#allocation2 + $0x10] sm:$0xff]  ;;  %vm45_vm0 = vcmask 261120   ;;  %v187_v5 = vmov 0   ;;  %v70_v6 = vlaneseq }
   0x7   :  { %61 = vmatpush.msra.mxu0 %v40_v0  ;;  %v38_v2 = vld [vmem:[#allocation2 + $0x8] sm:$0xff]  ;;  %v37_v3 = vld [vmem:[#allocation2] sm:$0xff]  ;;  %126 = vset.pattern.permute.xlu0 %v187_v5  ;;  %vm74_vm2 = vcmask 1041408   ;;  %s106_s7 = sshll.u32 %s244_s4, 4  ;;  %vm97_vm4 = vcmask 1024   ;;  %s107_s7 = int_to_ptr.hbm [resolvable:$true] %s106_s7 }
   0x8   :  { %v36_v4 = vld [vmem:[%s240_s0] sm:$0x3]  ;;  %v71_v7 = vand.u32 127, %v70_v6 }
   0x9   :  { %62 = vmatpush.msra.mxu0 %v39_v1  ;;  %v127_v8 = vld [vmem:[%s242_s2] ss:$0 sm:$0xff]  ;;  %s188_s2 = smov [#allocation5]  }
   0xa   :  { %vm72_vm1 = vcmp.lt.s32.totalorder %v71_v7, 2  ;;  %v87_v13 = vld [vmem:[%s243_s3] sm:$0x3]  ;;  %s104_s29 = sshll.u32 %s188_s2, 4  ;;  %s105_s29 = int_to_ptr.vmem [resolvable:$true] %s104_s29 }
   0xb   :  { %63 = vmatpush.msra.mxu0 %v38_v2 }
   0xd   :  { %64 = vmatpush.msra.mxu0 %v37_v3 }
   0xe   :  { %120 = vmatmul.msk.f32.vlgmr.msra.gmra.mxu0 %vm45_vm0, %v36_v4 }
  0x8b   :  { %v66_v9 = vpop.f32.mrf.mxu0 }
  0x8c   :  { %v67_v10 = vadd.f32 %v127_v8, %v66_v9 }
  0x8e   :  { %69 = vst [vmem:[#allocation5] sm:$0x3] %v67_v10  ;;  %v73_v11 = vsel %vm72_vm1, %v67_v10, -1e+30 }
  0x8f   :  { %v75_v12 = vsel %vm74_vm2, %v73_v11, -inf  ;;  %109 = dma.vmem_to_hbm [thread:$0]  %s105_s29, 32, %s107_s7, [#allocation4]  }
  0x90   :  { %76 = vmax.xlane.f32.xlu0 %v75_v12 }
  0xa4   :  { %89 = vperm.xlu0 %126, %v87_v13  }
 0x103   :  { %v77_v14 = vpop.xlane.xlu0 %76 }
 0x104   :  { %v78_v15 = vsub.f32 %v73_v11, %v77_v14 }
 0x106   :  { %v79_v16 = vmul.f32 1.442695, %v78_v15 }
 0x108   :  { %128 = vpow2.f32 %v79_v16 }
 0x10e   :  { %v129_v17 = vpop.eup %128 }
 0x10f   :  { %v81_v18 = vsel %vm74_vm2, %v129_v17, 0.0 }
 0x110   :  { %82 = vadd.xlane.f32.xlu1 %v81_v18 }
 0x116   :  { %v90_v19 = vpop.permute.xlu0 %89 }
 0x117   :  { %vm91_vm3 = vcmp.eq.s32.totalorder %v71_v7, %v90_v19 }
 0x118   :  { %v92_v20 = vsel %vm91_vm3, %v67_v10, 0.0 }
 0x119   :  { %v93_v21 = vsel %vm74_vm2, %v92_v20, 0.0 }
 0x11a   :  { %94 = vadd.xlane.f32.xlu1 %v93_v21 }
 0x183   :  { %v83_v22 = vpop.xlane.xlu1 %82 }
 0x184   :  { %130 = vlog2.f32 %v83_v22 }
 0x18a   :  { %v131_v23 = vpop.eup %130 }
 0x18b   :  { %v85_v24 = vmul.f32 0.6931472, %v131_v23 }
 0x18d   :  { %v86_v25 = vadd.f32 %v85_v24, %v77_v14  ;;  %v95_v26 = vpop.xlane.xlu1 %94 }
 0x18f   :  { %v96_v27 = vsub.f32 %v86_v25, %v95_v26 }
 0x191   :  { %98 = vst.msk [vmem:[%s245_s5] sm:$0x3] %vm97_vm4, %v96_v27 }
 0x192   :  { %182 = dma.done.wait [#allocation4], 32  }
 0x193   :  { %183 = vsyncadd [#allocation4], 4294967264 }
 0x194   :  { %118 = vsyncpa [#allocation3], 1 }
 0x195   :  { %119 = vsyncpa [#allocation4], 1 }

</bundles_post_ra>
